<compile_context>
chip_gen: v5e
topology: v5e:2x2
jax: 0.10.0
libtpu: 0.0.40
codegen_flags: <defaults>
</compile_context>

<pallas_src>
import math
import jax
import jax.numpy as jnp
from jax.experimental import pallas as pl
from jax.experimental.pallas import tpu as pltpu

_LANE = 128


def _round_up(v, m):
    return ((v + m - 1) // m) * m


def _num_tensorcores():
    """2 on megacore chips (v7x), else 1. Safe fallback to 1."""
    try:
        kind = jax.devices()[0].device_kind.lower()
    except Exception:
        return 1
    return 2 if ("v7" in kind or "tpu7" in kind) else 1


def _make_mlp_kernel(num_layers):
    """Kernel factory: refs = (xT, w0, b0, w1, b1, ..., out).

    xT block:  (n_in, TB)   -- batch in the LANE dimension (lane-dense)
    w_l:       (out_l, in_l) PyTorch layout, resident in VMEM
    b_l:       (out_l, 1)    f32, resident in VMEM
    out block: (n_out, TB)   -- lane-dense stores
    """

    def kernel(*refs):
        x_ref = refs[0]
        o_ref = refs[-1]
        p_refs = refs[1:-1]
        cdt = x_ref.dtype                       # MXU compute dtype (f32 or bf16)
        h = x_ref[...]                          # (n_in, TB)
        for l in range(num_layers):
            w = p_refs[2 * l][...]              # (out_l, in_l)
            b = p_refs[2 * l + 1][...]          # (out_l, 1), f32
            in_l = w.shape[1]
            if l == 0 and in_l <= 4:
                # Tiny K: do layer 0 on the VPU as broadcast multiply-adds instead of
                # an MXU pass with K=2 (keeps the vex slot free, f32 accumulate).
                wf = w.astype(jnp.float32)
                hf = h.astype(jnp.float32)
                acc = wf[:, 0:1] * hf[0:1, :] + b          # (out_l, TB)
                for kk in range(1, in_l):
                    acc = acc + wf[:, kk:kk + 1] * hf[kk:kk + 1, :]
            else:
                acc = jnp.dot(w, h, preferred_element_type=jnp.float32) + b
            if l < num_layers - 1:
                acc = jnp.tanh(acc)             # EUP slot, f32 accumulator
                h = acc.astype(cdt)             # feed next matmul in compute dtype
            else:
                h = acc                         # last Linear: no activation
        o_ref[...] = h.astype(o_ref.dtype)      # lane-dense (n_out, TB) store

    return kernel


def prepare_params(params, compute_dtype=jnp.float32):
    """One-time glue (do at init, NOT per forward call).

    Weights stay in PyTorch (out, in) layout (the kernel computes W @ h with batch in
    lanes, so no transpose is needed at all); biases become (out, 1) f32 columns.
    Use compute_dtype=jnp.bfloat16 on v6e/v7x for bf16 MXU inputs with f32 accumulate.
    """
    flat = []
    for w, b in params:
        flat.append(jnp.asarray(w).astype(compute_dtype))            # (out, in)
        flat.append(jnp.asarray(b).reshape(-1, 1).astype(jnp.float32))  # (out, 1)
    return flat


def nn_tanh_forward(x, flat_params, *, tb=2048):
    """x: (B, n_in). flat_params: output of prepare_params().
    Returns (network(x), x), matching NNTanh.forward."""
    B, n_in = x.shape
    num_layers = len(flat_params) // 2
    n_out = flat_params[-2].shape[0]
    out_dtype = x.dtype
    cdt = flat_params[0].dtype                  # compute dtype comes from prepared weights
    dims = [n_in] + [flat_params[2 * l].shape[0] for l in range(num_layers)]

    # ---- Batch tiling: batch lives on the LANE axis, so tiles are multiples of 128 and
    # every load/store is lane-dense.  Large default tile amortises per-step overhead.
    ncores = _num_tensorcores()
    tb_eff = min(max(tb, _LANE), _round_up(B, _LANE))
    tb_eff = _round_up(tb_eff, _LANE)
    num_tiles = -(-B // tb_eff)
    if ncores > 1:
        # v7x megacore: split a single tile so both TensorCores get work, and keep the
        # "parallel" grid axis a multiple of the core count so neither core idles.
        if num_tiles == 1 and tb_eff > _LANE:
            tb_eff = _round_up((tb_eff + 1) // 2, _LANE)
            num_tiles = -(-B // tb_eff)
        if num_tiles > 1 and num_tiles % ncores:
            num_tiles += ncores - (num_tiles % ncores)
    Bp = num_tiles * tb_eff

    xT = x.T.astype(cdt)                        # (n_in, B) -- lane-dense input slab
    if Bp != B:
        xT = jnp.pad(xT, ((0, 0), (0, Bp - B)))

    in_specs = [pl.BlockSpec((n_in, tb_eff), lambda i: (0, i))]       # x tile
    for l in range(num_layers):
        o_dim, i_dim = flat_params[2 * l].shape
        in_specs.append(pl.BlockSpec((o_dim, i_dim), lambda i: (0, 0)))  # resident W
        in_specs.append(pl.BlockSpec((o_dim, 1), lambda i: (0, 0)))      # resident b
    # TODO(synk): on v7x with wide hidden layers (e.g. 512x8 f32), single-buffer the
    # resident weight/bias specs (pipeline_mode=pl.Buffered(1)) to halve their VMEM
    # footprint; at these layer widths double-buffering costs only a few hundred KiB.
    out_specs = pl.BlockSpec((n_out, tb_eff), lambda i: (0, i))       # lane-dense out

    # ---- Advisory cost estimate for XLA's scheduler.
    flops = 2 * B * sum(a * b for a, b in zip(dims, dims[1:]))
    transcendentals = B * sum(dims[1:-1])
    bytes_accessed = int(
        x.size * jnp.dtype(cdt).itemsize
        + B * n_out * jnp.dtype(out_dtype).itemsize
        + sum(int(p.size) * p.dtype.itemsize for p in flat_params))

    # ---- Rough VMEM accounting; only override the scoped default when we would exceed
    # the conservative (v5e) 16 MiB default.
    it_c = jnp.dtype(cdt).itemsize
    vmem_est = 2 * _round_up(n_in, 8) * tb_eff * it_c                 # x (double-buffered)
    vmem_est += 2 * _round_up(n_out, 8) * tb_eff * jnp.dtype(out_dtype).itemsize
    for l in range(num_layers):
        o_dim, i_dim = flat_params[2 * l].shape
        vmem_est += 2 * _round_up(o_dim, 8) * _round_up(i_dim, _LANE) * it_c
        vmem_est += 2 * _round_up(o_dim, 8) * _LANE * 4
    vmem_est += _round_up(max(dims[1:]), 8) * tb_eff * (4 + it_c)     # live activations
    vmem_limit = None
    if vmem_est * 2 > 12 * 2**20:
        vmem_limit = int(min(vmem_est * 2 + (4 << 20), 100 * 2**20))

    out = pl.pallas_call(
        _make_mlp_kernel(num_layers),
        out_shape=jax.ShapeDtypeStruct((n_out, Bp), out_dtype),
        grid_spec=pltpu.PrefetchScalarGridSpec(
            num_scalar_prefetch=0,
            grid=(num_tiles,),
            in_specs=in_specs,
            out_specs=out_specs,
        ),
        compiler_params=pltpu.CompilerParams(
            dimension_semantics=("parallel",),
            vmem_limit_bytes=vmem_limit,
        ),
        cost_estimate=pl.CostEstimate(
            flops=int(flops),
            transcendentals=int(transcendentals),
            bytes_accessed=bytes_accessed,
        ),
    )(xT, *flat_params)

    y = out[:, :B].T                            # (B, n_out); trivial when n_out == 1
    # TODO(synk): PyTorch clones/detaches the coordinates and sets requires_grad_; in JAX
    # autograd is handled by jax.grad, so we simply return the input alongside the output.
    return y, x


def nn_tanh_ref(x, params):
    """Pure-JAX reference with PyTorch semantics: Linear(+Tanh) stack, no final Tanh."""
    h = x
    for idx, (w, b) in enumerate(params):
        h = h @ w.T + b
        if idx < len(params) - 1:
            h = jnp.tanh(h)
    return h, x


def _make_params(key, dims):
    """Deterministic PyTorch-style Linear init: U(-1/sqrt(fan_in), 1/sqrt(fan_in))."""
    params = []
    for fan_in, fan_out in zip(dims, dims[1:]):
        key, kw, kb = jax.random.split(key, 3)
        bound = 1.0 / math.sqrt(fan_in)
        w = jax.random.uniform(kw, (fan_out, fan_in), jnp.float32, -bound, bound)
        b = jax.random.uniform(kb, (fan_out,), jnp.float32, -bound, bound)
        params.append((w, b))
    return key, params


if __name__ == "__main__":
    # Small coordinate-network shapes consistent with the module (PINN-style).
    n_in, n_hidden, n_out = 2, [32, 32], 1
    dims = [n_in] + n_hidden + [n_out]

    key = jax.random.PRNGKey(0)
    key, params = _make_params(key, dims)

    # --- f32 path, single tile (B=64 pads to one 128-lane tile) ---
    key, kx = jax.random.split(key)
    x = jax.random.normal(kx, (64, n_in), dtype=jnp.float32)
    flat_f32 = prepare_params(params, compute_dtype=jnp.float32)
    y, coords = nn_tanh_forward(x, flat_f32)
    y = jax.block_until_ready(y)
    y_ref, _ = nn_tanh_ref(x, params)
    assert y.shape == (64, n_out) and y.dtype == jnp.float32
    assert jnp.allclose(y, y_ref, atol=1e-5, rtol=1e-5)
    assert jnp.array_equal(coords, x)

    # --- f32 path, multi-tile grid with batch padding (exercises index maps) ---
    key, kx = jax.random.split(key)
    x2 = jax.random.normal(kx, (1000, n_in), dtype=jnp.float32)
    y2, _ = nn_tanh_forward(x2, flat_f32, tb=256)
    y2 = jax.block_until_ready(y2)
    y2_ref, _ = nn_tanh_ref(x2, params)
    assert y2.shape == (1000, n_out)
    assert jnp.allclose(y2, y2_ref, atol=1e-5, rtol=1e-5)

    # --- bf16 compute path (recommended on v6e/v7x), relaxed tolerance ---
    flat_bf16 = prepare_params(params, compute_dtype=jnp.bfloat16)
    y3, _ = nn_tanh_forward(x2, flat_bf16, tb=512)
    y3 = jax.block_until_ready(y3)
    assert y3.shape == (1000, n_out) and y3.dtype == jnp.float32
    assert jnp.allclose(y3, y2_ref, atol=5e-2, rtol=5e-2)

    print("KERNEL_OK")
</pallas_src>

<mosaic_0001>
module attributes {stable_mosaic.version = 11 : i64} {
  func.func @kernel(%arg0: i32, %arg1: memref<2x128xf32, #tpu.memory_space<vmem>>, %arg2: memref<32x2xf32, #tpu.memory_space<vmem>>, %arg3: memref<32x1xf32, #tpu.memory_space<vmem>>, %arg4: memref<32x32xf32, #tpu.memory_space<vmem>>, %arg5: memref<32x1xf32, #tpu.memory_space<vmem>>, %arg6: memref<1x32xf32, #tpu.memory_space<vmem>>, %arg7: memref<1x1xf32, #tpu.memory_space<vmem>>, %arg8: memref<1x128xf32, #tpu.memory_space<vmem>>) attributes {dimension_semantics = [#tpu.dimension_semantics<parallel>], iteration_bounds = array<i64: 1>, scalar_prefetch = 0 : i64, scratch_operands = 0 : i64, tpu.core_type = #tpu.core_type<tc>, window_params = [{transform_indices = @transform_0, window_bounds = array<i64: 2, 128>}, {pipeline_mode = #tpu.pipeline_mode<synchronous>, transform_indices = @transform_1, window_bounds = array<i64: 32, 2>}, {pipeline_mode = #tpu.pipeline_mode<synchronous>, transform_indices = @transform_2, window_bounds = array<i64: 32, 1>}, {pipeline_mode = #tpu.pipeline_mode<synchronous>, transform_indices = @transform_3, window_bounds = array<i64: 32, 32>}, {pipeline_mode = #tpu.pipeline_mode<synchronous>, transform_indices = @transform_4, window_bounds = array<i64: 32, 1>}, {pipeline_mode = #tpu.pipeline_mode<synchronous>, transform_indices = @transform_5, window_bounds = array<i64: 1, 32>}, {pipeline_mode = #tpu.pipeline_mode<synchronous>, transform_indices = @transform_6, window_bounds = array<i64: 1, 1>}, {transform_indices = @transform_7, window_bounds = array<i64: 1, 128>}]} {
    %c0 = arith.constant 0 : index
    %c0_0 = arith.constant 0 : index
    %0 = vector.load %arg1[%c0, %c0_0] : memref<2x128xf32, #tpu.memory_space<vmem>>, vector<2x128xf32>
    %c0_1 = arith.constant 0 : index
    %c0_2 = arith.constant 0 : index
    %1 = vector.load %arg2[%c0_1, %c0_2] : memref<32x2xf32, #tpu.memory_space<vmem>>, vector<32x2xf32>
    %c0_3 = arith.constant 0 : index
    %c0_4 = arith.constant 0 : index
    %2 = vector.load %arg3[%c0_3, %c0_4] : memref<32x1xf32, #tpu.memory_space<vmem>>, vector<32x1xf32>
    %3 = vector.extract_strided_slice %1 {offsets = [0, 0], sizes = [32, 1], strides = [1, 1]} : vector<32x2xf32> to vector<32x1xf32>
    %4 = vector.extract_strided_slice %0 {offsets = [0, 0], sizes = [1, 128], strides = [1, 1]} : vector<2x128xf32> to vector<1x128xf32>
    %5 = vector.broadcast %3 : vector<32x1xf32> to vector<32x128xf32>
    %6 = vector.broadcast %4 : vector<1x128xf32> to vector<32x128xf32>
    %7 = arith.mulf %5, %6 : vector<32x128xf32>
    %8 = vector.broadcast %2 : vector<32x1xf32> to vector<32x128xf32>
    %9 = arith.addf %7, %8 : vector<32x128xf32>
    %10 = vector.extract_strided_slice %1 {offsets = [0, 1], sizes = [32, 1], strides = [1, 1]} : vector<32x2xf32> to vector<32x1xf32>
    %11 = vector.extract_strided_slice %0 {offsets = [1, 0], sizes = [1, 128], strides = [1, 1]} : vector<2x128xf32> to vector<1x128xf32>
    %12 = vector.broadcast %10 : vector<32x1xf32> to vector<32x128xf32>
    %13 = vector.broadcast %11 : vector<1x128xf32> to vector<32x128xf32>
    %14 = arith.mulf %12, %13 : vector<32x128xf32>
    %15 = arith.addf %9, %14 : vector<32x128xf32>
    %16 = math.tanh %15 : vector<32x128xf32>
    %c0_5 = arith.constant 0 : index
    %c0_6 = arith.constant 0 : index
    %17 = vector.load %arg4[%c0_5, %c0_6] : memref<32x32xf32, #tpu.memory_space<vmem>>, vector<32x32xf32>
    %c0_7 = arith.constant 0 : index
    %c0_8 = arith.constant 0 : index
    %18 = vector.load %arg5[%c0_7, %c0_8] : memref<32x1xf32, #tpu.memory_space<vmem>>, vector<32x1xf32>
    %cst = arith.constant dense<0.000000e+00> : vector<32x128xf32>
    %19 = tpu.matmul %17, %16, %cst {dimension_numbers = #tpu.dot_dimension_numbers<[1], [0], [0], [1], [0, 0, 1, 1], [], []>} : vector<32x32xf32>, vector<32x128xf32>, vector<32x128xf32> -> vector<32x128xf32>
    %20 = vector.broadcast %18 : vector<32x1xf32> to vector<32x128xf32>
    %21 = arith.addf %19, %20 : vector<32x128xf32>
    %22 = math.tanh %21 : vector<32x128xf32>
    %c0_9 = arith.constant 0 : index
    %c0_10 = arith.constant 0 : index
    %23 = vector.load %arg6[%c0_9, %c0_10] : memref<1x32xf32, #tpu.memory_space<vmem>>, vector<1x32xf32>
    %c0_11 = arith.constant 0 : index
    %c0_12 = arith.constant 0 : index
    %24 = vector.load %arg7[%c0_11, %c0_12] : memref<1x1xf32, #tpu.memory_space<vmem>>, vector<1x1xf32>
    %cst_13 = arith.constant dense<0.000000e+00> : vector<1x128xf32>
    %25 = tpu.matmul %23, %22, %cst_13 {dimension_numbers = #tpu.dot_dimension_numbers<[1], [0], [0], [1], [0, 0, 1, 1], [], []>} : vector<1x32xf32>, vector<32x128xf32>, vector<1x128xf32> -> vector<1x128xf32>
    %26 = vector.broadcast %24 : vector<1x1xf32> to vector<1x128xf32>
    %27 = arith.addf %25, %26 : vector<1x128xf32>
    %c0_14 = arith.constant 0 : index
    %c0_15 = arith.constant 0 : index
    %28 = vector.load %arg8[%c0_14, %c0_15] : memref<1x128xf32, #tpu.memory_space<vmem>>, vector<1x128xf32>
    tpu.vector_store %arg8[%c0_14, %c0_15], %27 {strides = array<i32>} : memref<1x128xf32, #tpu.memory_space<vmem>>, vector<1x128xf32>,
    return
  }
  func.func @transform_0(%arg0: i32) -> (i32, i32) {
    %c0_i32 = arith.constant 0 : i32
    %c0_i32_0 = arith.constant 0 : i32
    return %c0_i32, %arg0 : i32, i32
  }
  func.func @transform_1(%arg0: i32) -> (i32, i32) {
    %c0_i32 = arith.constant 0 : i32
    %c0_i32_0 = arith.constant 0 : i32
    %c0_i32_1 = arith.constant 0 : i32
    return %c0_i32, %c0_i32_0 : i32, i32
  }
  func.func @transform_2(%arg0: i32) -> (i32, i32) {
    %c0_i32 = arith.constant 0 : i32
    %c0_i32_0 = arith.constant 0 : i32
    %c0_i32_1 = arith.constant 0 : i32
    return %c0_i32, %c0_i32_0 : i32, i32
  }
  func.func @transform_3(%arg0: i32) -> (i32, i32) {
    %c0_i32 = arith.constant 0 : i32
    %c0_i32_0 = arith.constant 0 : i32
    %c0_i32_1 = arith.constant 0 : i32
    return %c0_i32, %c0_i32_0 : i32, i32
  }
  func.func @transform_4(%arg0: i32) -> (i32, i32) {
    %c0_i32 = arith.constant 0 : i32
    %c0_i32_0 = arith.constant 0 : i32
    %c0_i32_1 = arith.constant 0 : i32
    return %c0_i32, %c0_i32_0 : i32, i32
  }
  func.func @transform_5(%arg0: i32) -> (i32, i32) {
    %c0_i32 = arith.constant 0 : i32
    %c0_i32_0 = arith.constant 0 : i32
    %c0_i32_1 = arith.constant 0 : i32
    return %c0_i32, %c0_i32_0 : i32, i32
  }
  func.func @transform_6(%arg0: i32) -> (i32, i32) {
    %c0_i32 = arith.constant 0 : i32
    %c0_i32_0 = arith.constant 0 : i32
    %c0_i32_1 = arith.constant 0 : i32
    return %c0_i32, %c0_i32_0 : i32, i32
  }
  func.func @transform_7(%arg0: i32) -> (i32, i32) {
    %c0_i32 = arith.constant 0 : i32
    %c0_i32_0 = arith.constant 0 : i32
    return %c0_i32, %arg0 : i32, i32
  }
}

</mosaic_0001>

<bundles_post_ra>
// kernel: tpu_custom_call.1
= control target key start
LH: loop header
LB: loop body
LE: loop exit
PB: predicated region body
PF: predicated region fallthrough
CT: control target
= control target key end

     0   :  { %s413_s0 = inlined_call_operand.vmem [shape: f32[2,128], index: 0, kind: input, shape index: {}]   ;;  %s414_s1 = inlined_call_operand.vmem [shape: f32[32,2], index: 1, kind: input, shape index: {}]   ;;  %s415_s2 = inlined_call_operand.vmem [shape: f32[32,1], index: 2, kind: input, shape index: {}]   ;;  %s416_s3 = inlined_call_operand.vmem [shape: f32[32,32], index: 3, kind: input, shape index: {}]   ;;  %s417_s4 = inlined_call_operand.vmem [shape: f32[32,1], index: 4, kind: input, shape index: {}]   ;;  %s418_s5 = inlined_call_operand.vmem [shape: f32[1,32], index: 5, kind: input, shape index: {}]   ;;  %s419_s6 = inlined_call_operand.<no memory space> [shape: f32[1,1], index: 6, kind: input, shape index: {}]   ;;  %s420_s7 = inlined_call_operand.hbm [shape: f32[1,128], index: 7, kind: output, shape index: {}]  }
   0x1   :  { %v12_v0 = vstv %s419_s6 }
   0x2   :  { %13 = vst [vmem:[#allocation2] sm:$0x1] %v12_v0 }
   0x3   :  { %v37_v1 = vld [vmem:[%s415_s2 + $0x18] sm:$0xff]  ;;  %v31_v3 = vld [vmem:[%s414_s1 + $0x8] sm:$0xff]  ;;  %v305_v4 = vmov 0  }
   0x4   :  { %v33_v2 = vld [vmem:[%s414_s1 + $0x18] sm:$0xff]  ;;  %257 = vset.pattern.permute.xlu2 %v305_v4  ;;  %255 = vset.pattern.permute.xlu1 %v305_v4 }
   0x5   :  { %254 = vset.pattern.permute.xlu0 %v305_v4  ;;  %80 = vperm.xlu1 %255, %v37_v1  }
   0x6   :  { %55 = vperm.xlu0 %254, %v33_v2   ;;  %45 = vperm.xlu2 %257, %v31_v3  }
   0x7   :  { %14 = vsyncpa [#allocation4], 0  ;;  %v32_v5 = vld [vmem:[%s414_s1 + $0x10] sm:$0xff]  ;;  %v306_v7 = vmov 1   ;;  %v35_v8 = vld [vmem:[%s415_s2 + $0x8] sm:$0xff]  ;;  %vm144_vm0 = vcmask 261120  }
   0x8   :  { %v36_v6 = vld [vmem:[%s415_s2 + $0x10] sm:$0xff]  ;;  %v30_v9 = vld [vmem:[%s414_s1] sm:$0xff]  ;;  %v123_v32 = vld [vmem:[%s417_s4 + $0x18] sm:$0xff]  ;;  %s307_s9 = smov [#allocation3]   ;;  %s229_s13 = sshll.u32 %s420_s7, 4  ;;  %s230_s13 = int_to_ptr.hbm [resolvable:$true] %s229_s13 }
   0x9   :  { %v34_v10 = vld [vmem:[%s415_s2] sm:$0xff]  ;;  %v122_v11 = vld [vmem:[%s417_s4 + $0x10] sm:$0xff]  ;;  %v121_v35 = vld [vmem:[%s417_s4 + $0x8] sm:$0xff]  ;;  %s227_s10 = sshll.u32 %s307_s9, 4  ;;  %s228_s10 = int_to_ptr.vmem [resolvable:$true] %s227_s10 }
   0xa   :  { %v191_v12 = vld [vmem:[#allocation2] sm:$0x1]  ;;  %v118_v52 = vld [vmem:[%s416_s3 + $0x10] sm:$0xff]  ;;  %v117_v53 = vld [vmem:[%s416_s3 + $0x8] sm:$0xff] }
   0xb   :  { %v29_v14 = vld [vmem:[%s413_s0] sm:$0x3]  ;;  %v119_v54 = vld [vmem:[%s416_s3 + $0x18] sm:$0xff] }
   0xc   :  { %v58_v17 = vperm.slane %v29_v14, 0  ;;  %v103_v19 = vperm.slane %v29_v14, 1  ;;  %v120_v39 = vld [vmem:[%s417_s4] sm:$0xff] }
   0xd   :  { %256 = vset.pattern.permute.xlu1 %v306_v7  ;;  %v116_v50 = vld [vmem:[%s416_s3] sm:$0xff] }
   0xe   :  { %50 = vperm.xlu0 %254, %v32_v5   ;;  %75 = vperm.xlu2 %257, %v36_v6   ;;  %v190_v6 = vld [vmem:[%s418_s5] sm:$0x1] }
   0xf   :  { %100 = vperm.xlu1 %256, %v33_v2  }
  0x16   :  { %258 = vset.pattern.permute.xlu0 %v306_v7  ;;  %70 = vperm.xlu2 %257, %v35_v8  }
  0x17   :  { %259 = vset.pattern.permute.xlu1 %v305_v4  ;;  %96 = vperm.xlu0 %258, %v32_v5  }
  0x18   :  { %40 = vperm.xlu1 %259, %v30_v9  }
  0x1e   :  { %65 = vperm.xlu2 %257, %v34_v10  }
  0x1f   :  { %88 = vperm.xlu0 %258, %v30_v9  }
  0x20   :  { %260 = vset.pattern.permute.xlu1 %v306_v7 }
  0x21   :  { %92 = vperm.xlu1 %260, %v31_v3  }
  0x26   :  { %136 = vperm.xlu2 %257, %v122_v11  }
  0x27   :  { %262 = vset.pattern.permute.xlu0 %v305_v4 }
  0x28   :  { %131 = vperm.xlu0 %262, %v121_v35  }
  0x29   :  { %261 = vset.pattern.permute.xlu1 %v305_v4 }
  0x2a   :  { %141 = vperm.xlu1 %261, %v123_v32  }
  0x2e   :  { %194 = vperm.xlu2 %257, %v191_v12  }
  0x32   :  { %126 = vperm.xlu1 %261, %v120_v39  }
  0x60   :  { %v46_v13 = vpop.permute.xlu2 %45 }
  0x61   :  { %v60_v36 = vmul.f32 %v58_v17, %v46_v13 }
  0x68   :  { %v76_v20 = vpop.permute.xlu2 %75 }
  0x70   :  { %v71_v27 = vpop.permute.xlu2 %70 }
  0x71   :  { %v84_v44 = vadd.f32 %v71_v27, %v60_v36 }
  0x77   :  { %v81_v15 = vpop.permute.xlu1 %80 }
  0x78   :  { %v56_v16 = vpop.permute.xlu0 %55  ;;  %v66_v41 = vpop.permute.xlu2 %65 }
  0x79   :  { %v62_v18 = vmul.f32 %v58_v17, %v56_v16 }
  0x7b   :  { %v86_v23 = vadd.f32 %v81_v15, %v62_v18 }
  0x80   :  { %v51_v21 = vpop.permute.xlu0 %50  ;;  %v137_v59 = vpop.permute.xlu2 %136 }
  0x81   :  { %v101_v22 = vpop.permute.xlu1 %100  ;;  %v61_v26 = vmul.f32 %v58_v17, %v51_v21 }
  0x82   :  { %v107_v24 = vmul.f32 %v103_v19, %v101_v22 }
  0x83   :  { %v85_v29 = vadd.f32 %v76_v20, %v61_v26 }
  0x84   :  { %v111_v25 = vadd.f32 %v107_v24, %v86_v23 }
  0x86   :  { %263 = vtanh.f32 %v111_v25 }
  0x88   :  { %v195_v8 = vpop.permute.xlu2 %194 }
  0x89   :  { %v97_v28 = vpop.permute.xlu0 %96  ;;  %v197_v9 = vperm.slane %v195_v8, 0 }
  0x8a   :  { %v106_v30 = vmul.f32 %v103_v19, %v97_v28  ;;  %v41_v31 = vpop.permute.xlu1 %40 }
  0x8b   :  { %v59_v37 = vmul.f32 %v58_v17, %v41_v31 }
  0x8c   :  { %v264_v33 = vpop.eup %263  ;;  %v110_v34 = vadd.f32 %v106_v30, %v85_v29 }
  0x8d   :  { %169 = vmatpush.msra.mxu0 %v264_v33  ;;  %243 = vmatpush.msra.mxu2 %v264_v33  ;;  %v83_v45 = vadd.f32 %v66_v41, %v59_v37 }
  0x8e   :  { %265 = vtanh.f32 %v110_v34  ;;  %244 = vmatpush.msra.mxu3 %v264_v33 }
  0x91   :  { %v89_v38 = vpop.permute.xlu0 %88 }
  0x92   :  { %v104_v40 = vmul.f32 %v103_v19, %v89_v38 }
  0x93   :  { %v93_v42 = vpop.permute.xlu1 %92 }
  0x94   :  { %v266_v43 = vpop.eup %265  ;;  %v105_v46 = vmul.f32 %v103_v19, %v93_v42  ;;  %v108_v47 = vadd.f32 %v104_v40, %v83_v45 }
  0x95   :  { %170 = vmatpush.msra.mxu0 %v266_v43  ;;  %245 = vmatpush.msra.mxu2 %v266_v43 }
  0x96   :  { %v109_v48 = vadd.f32 %v105_v46, %v84_v44  ;;  %246 = vmatpush.msra.mxu3 %v266_v43 }
  0x98   :  { %267 = vtanh.f32 %v109_v48 }
  0x99   :  { %269 = vtanh.f32 %v108_v47 }
  0x9a   :  { %v132_v57 = vpop.permute.xlu0 %131 }
  0x9c   :  { %v142_v55 = vpop.permute.xlu1 %141 }
  0x9e   :  { %v268_v49 = vpop.eup %267 }
  0x9f   :  { %171 = vmatpush.msra.mxu0 %v268_v49  ;;  %247 = vmatpush.msra.mxu2 %v268_v49  ;;  %v270_v51 = vpop.eup %269 }
  0xa0   :  { %248 = vmatpush.msra.mxu3 %v268_v49 }
  0xa1   :  { %172 = vmatpush.msra.mxu0 %v270_v51  ;;  %249 = vmatpush.msra.mxu2 %v270_v51 }
  0xa2   :  { %250 = vmatpush.msra.mxu3 %v270_v51  ;;  %238 = vmatmul.msk.f32.vlgmr.msra.gmra.mxu0 %vm144_vm0, %v116_v50 }
  0xa3   :  { %240 = vmatmul.msk.f32.vlgmr.msra.gmra.mxu3 %vm144_vm0, %v118_v52  ;;  %239 = vmatmul.msk.f32.vlgmr.msra.gmra.mxu2 %vm144_vm0, %v117_v53 }
  0xa4   :  { %v127_v0 = vpop.permute.xlu1 %126 }
  0xab   :  { %241 = vmatmul.msk.f32.gmra.mxu3 %vm144_vm0, %v119_v54 }
 0x11f   :  { %v174_v1 = vpop.f32.mrf.mxu0 }
 0x120   :  { %v175_v2 = vadd.f32 %v174_v1, %v127_v0 }
 0x126   :  { %v180_v56 = vpop.f32.mrf.mxu3  ;;  %v177_v58 = vpop.f32.mrf.mxu2 }
 0x127   :  { %v181_v60 = vadd.f32 %v180_v56, %v137_v59  ;;  %v178_v63 = vadd.f32 %v177_v58, %v132_v57 }
 0x12e   :  { %v183_v61 = vpop.f32.mrf.mxu3 }
 0x12f   :  { %v184_v62 = vadd.f32 %v183_v61, %v142_v55 }
 0x131   :  { %271 = vtanh.f32 %v184_v62 }
 0x132   :  { %273 = vtanh.f32 %v181_v60 }
 0x133   :  { %275 = vtanh.f32 %v178_v63 }
 0x134   :  { %277 = vtanh.f32 %v175_v2 }
 0x137   :  { %v272_v3 = vpop.eup %271 }
 0x138   :  { %v274_v4 = vpop.eup %273  ;;  %213 = vmatpush.msra.mxu1 %v272_v3 }
 0x139   :  { %v276_v5 = vpop.eup %275 }
 0x13a   :  { %214 = vmatpush.msra.mxu1 %v274_v4  ;;  %v278_v7 = vpop.eup %277 }
 0x13c   :  { %215 = vmatpush.msra.mxu1 %v276_v5 }
 0x13e   :  { %216 = vmatpush.msra.mxu1 %v278_v7 }
 0x13f   :  { %242 = vmatmul.msk.f32.vlgmr.msra.gmra.mxu1 %vm144_vm0, %v190_v6 }
 0x1bc   :  { %v218_v10 = vpop.f32.mrf.mxu1 }
 0x1bd   :  { %v219_v11 = vadd.f32 %v218_v10, %v197_v9 }
 0x1bf   :  { %221 = vst [vmem:[#allocation3] sm:$0x1] %v219_v11 }
 0x1c0   :  { %232 = dma.vmem_to_hbm [thread:$0]  %s228_s10, 16, %s230_s13, [#allocation4]  }
 0x1c1   :  { %303 = dma.done.wait [#allocation4], 16  }
 0x1c2   :  { %304 = vsyncadd [#allocation4], 4294967280 }
 0x1c3   :  { %237 = vsyncpa [#allocation4], 1 }

</bundles_post_ra>
